<compile_context>
chip_gen: v7x
topology: tpu7x:2x2x1
jax: 0.10.0
libtpu: 0.0.40
codegen_flags: <defaults>
</compile_context>

<pallas_src>
import jax
import jax.numpy as jnp
from jax.experimental import pallas as pl
from jax.experimental.pallas import tpu as pltpu

EPS = 1e-5  # PyTorch nn.LayerNorm default


def _round_up(n, m):
    return ((n + m - 1) // m) * m


def _vmem_capacity_bytes():
    try:
        return int(pltpu.get_tpu_info().vmem_capacity_bytes)
    except Exception:
        return 64 * 2**20  # conservative (v7x per-TensorCore size)


# --------------------------- kernels ---------------------------------------


def _prenorm_linear_kernel(x_ref, w_ref, wb_ref, o_ref):
    """Weight fully resident: LayerNorm (affine folded into W/bias) + matmul."""
    x = x_ref[...].astype(jnp.float32)
    mean = jnp.mean(x, axis=-1, keepdims=True)
    centered = x - mean
    var = jnp.mean(centered * centered, axis=-1, keepdims=True)
    xhat = centered * jax.lax.rsqrt(var + EPS)
    out = jnp.dot(xhat.astype(w_ref.dtype), w_ref[...],
                  preferred_element_type=jnp.float32)
    out = out + wb_ref[...].astype(jnp.float32)
    o_ref[...] = out.astype(o_ref.dtype)


def _prenorm_linear_ntiled_kernel(x_ref, w_ref, wb_ref, o_ref, xhat_ref):
    """N-tiled weight: LayerNorm computed once per row tile (n == 0) into a
    VMEM scratch; the inner N loop only runs the MXU."""
    @pl.when(pl.program_id(1) == 0)
    def _():
        x = x_ref[...].astype(jnp.float32)
        mean = jnp.mean(x, axis=-1, keepdims=True)
        centered = x - mean
        var = jnp.mean(centered * centered, axis=-1, keepdims=True)
        xhat_ref[...] = (centered * jax.lax.rsqrt(var + EPS)).astype(xhat_ref.dtype)

    out = jnp.dot(xhat_ref[...], w_ref[...], preferred_element_type=jnp.float32)
    out = out + wb_ref[...].astype(jnp.float32)
    o_ref[...] = out.astype(o_ref.dtype)


# --------------------------- wrapper ----------------------------------------


def prenorm_linear(x, gamma, beta, w, w_bias, *, tile_rows=None, block_n=None,
                   mxu_dtype=None):
    """PreNorm(dim, Linear): fn(LayerNorm(x)) with fn(y) = y @ w + w_bias.

    x: (B, S, D); w: (D, N).  NOTE: PyTorch nn.Linear stores its weight as
    (out_features, in_features) and computes x @ W.T — pass ``weight.T`` when
    porting a real checkpoint.
    """
    B, S, D = x.shape
    d_in, N = w.shape
    assert d_in == D
    rows = B * S
    out_dtype = x.dtype

    if mxu_dtype is None:
        mxu_dtype = w.dtype
    mxu_dtype = jnp.dtype(mxu_dtype)

    # Fold the LayerNorm affine into the linear layer (done once, in f32):
    #   (xhat*gamma + beta) @ W + b  ==  xhat @ (gamma[:,None]*W) + (beta@W + b)
    w_f32 = w.astype(jnp.float32)
    w_folded = (gamma.astype(jnp.float32)[:, None] * w_f32).astype(mxu_dtype)
    b_folded = (beta.astype(jnp.float32) @ w_f32
                + w_bias.astype(jnp.float32)).reshape(1, N)

    # Sublane packing: 8 rows for 4-byte dtypes, 16 for 2-byte (bf16).
    sub = 16 if x.dtype == jnp.bfloat16 else 8
    itemsize_x = jnp.dtype(x.dtype).itemsize
    itemsize_o = jnp.dtype(out_dtype).itemsize
    itemsize_w = mxu_dtype.itemsize

    # Row tile sized so the x tile is ~2 MiB (HBM-roofline territory), up to
    # 1024 rows; keep >= 2 row tiles when possible (v7x megacore split).
    if tile_rows is None:
        tile_rows = (2 << 20) // max(1, D * itemsize_x)
        tile_rows = max(sub, min(1024, (tile_rows // sub) * sub))
    tile_rows = max(sub, (tile_rows // sub) * sub)
    tile_rows = min(tile_rows, _round_up(rows, sub))
    if rows >= 2 * sub:
        tile_rows = min(tile_rows, _round_up((rows + 1) // 2, sub))
    rows_p = _round_up(rows, tile_rows)
    n_row_tiles = rows_p // tile_rows

    vmem_cap = _vmem_capacity_bytes()
    vmem_budget = max(16 << 20, vmem_cap - (8 << 20))  # leave compiler headroom

    def footprint_untiled():
        return (2 * tile_rows * D * itemsize_x      # x (double-buffered)
                + 2 * tile_rows * N * itemsize_o    # out (double-buffered)
                + D * N * itemsize_w                # resident W'
                + N * 4                             # folded bias
                + 3 * tile_rows * D * 4             # f32 upcast / xhat / MXU cast
                + tile_rows * N * 4)                # f32 accumulator

    def footprint_ntiled(bn):
        return (2 * tile_rows * D * itemsize_x      # x (constant over inner axis)
                + tile_rows * D * itemsize_w        # xhat scratch
                + 2 * D * bn * itemsize_w           # W tile (double-buffered)
                + 2 * tile_rows * bn * itemsize_o   # out (double-buffered)
                + 2 * bn * 4                        # bias tile
                + 2 * tile_rows * D * 4             # f32 LN intermediates
                + tile_rows * bn * 4)               # f32 accumulator

    # N-tile the weight ONLY if the untiled footprint overflows VMEM.
    if block_n is None:
        if footprint_untiled() <= vmem_budget:
            block_n = N
        else:
            divisors = [d for d in range(N, 0, -1) if N % d == 0]
            block_n = next((d for d in divisors
                            if (d % 128 == 0 or d == N)
                            and footprint_ntiled(d) <= vmem_budget), None)
            if block_n is None:
                block_n = next((d for d in divisors
                                if footprint_ntiled(d) <= vmem_budget),
                               divisors[-1])
    assert N % block_n == 0, "block_n must divide the output dim"

    needed = footprint_untiled() if block_n == N else footprint_ntiled(block_n)
    vmem_limit = int(min(vmem_budget, max(32 << 20, needed + (4 << 20))))

    x2d = x.reshape(rows, D)
    if rows_p != rows:
        # Padded rows LayerNorm to finite garbage; they are sliced off below.
        x2d = jnp.pad(x2d, ((0, rows_p - rows), (0, 0)))

    if block_n == N:
        # Weight fully resident; x streams once; LN computed once per row.
        single = pl.Buffered(1)  # grid-invariant operands: no double-buffer
        out2d = pl.pallas_call(
            _prenorm_linear_kernel,
            out_shape=jax.ShapeDtypeStruct((rows_p, N), out_dtype),
            grid_spec=pltpu.PrefetchScalarGridSpec(
                num_scalar_prefetch=0,
                grid=(n_row_tiles,),
                in_specs=[
                    pl.BlockSpec((tile_rows, D), lambda i: (i, 0)),   # x rows
                    pl.BlockSpec((D, N), lambda i: (0, 0),
                                 pipeline_mode=single),               # folded W
                    pl.BlockSpec((1, N), lambda i: (0, 0),
                                 pipeline_mode=single),               # folded bias
                ],
                out_specs=pl.BlockSpec((tile_rows, N), lambda i: (i, 0)),
            ),
            compiler_params=pltpu.CompilerParams(
                dimension_semantics=("parallel",),
                vmem_limit_bytes=vmem_limit),
        )(x2d, w_folded, b_folded)
    else:
        # Rows OUTER, N INNER: x block index constant over the inner loop (no
        # HBM re-reads), LN done once per row tile into the VMEM scratch, W
        # tile streams with default double-buffering so its DMA overlaps.
        out2d = pl.pallas_call(
            _prenorm_linear_ntiled_kernel,
            out_shape=jax.ShapeDtypeStruct((rows_p, N), out_dtype),
            grid_spec=pltpu.PrefetchScalarGridSpec(
                num_scalar_prefetch=0,
                grid=(n_row_tiles, N // block_n),
                in_specs=[
                    pl.BlockSpec((tile_rows, D), lambda i, n: (i, 0)),  # x (resident over n)
                    pl.BlockSpec((D, block_n), lambda i, n: (0, n)),    # W tile
                    pl.BlockSpec((1, block_n), lambda i, n: (0, n)),    # bias tile
                ],
                out_specs=pl.BlockSpec((tile_rows, block_n),
                                       lambda i, n: (i, n)),
                scratch_shapes=[pltpu.VMEM((tile_rows, D), mxu_dtype)],
            ),
            compiler_params=pltpu.CompilerParams(
                dimension_semantics=("parallel", "arbitrary"),
                vmem_limit_bytes=vmem_limit),
        )(x2d, w_folded, b_folded)

    if rows_p != rows:
        out2d = out2d[:rows]
    return out2d.reshape(B, S, N)


# --------------------------- reference & demo --------------------------------


def _reference(x, gamma, beta, w, w_bias):
    xf = x.astype(jnp.float32)
    mean = jnp.mean(xf, axis=-1, keepdims=True)
    var = jnp.mean((xf - mean) ** 2, axis=-1, keepdims=True)
    xhat = (xf - mean) / jnp.sqrt(var + EPS)
    y = xhat * gamma + beta
    return (y @ w.astype(jnp.float32) + w_bias).astype(x.dtype)


def _make_inputs(key, B, S, D):
    kx, kw, kb, kg, kbt = jax.random.split(key, 5)
    x = jax.random.normal(kx, (B, S, D), dtype=jnp.float32)
    # nn.LayerNorm(dim) learnable affine (randomized to exercise the math).
    gamma = 1.0 + 0.1 * jax.random.normal(kg, (D,), dtype=jnp.float32)
    beta = 0.1 * jax.random.normal(kbt, (D,), dtype=jnp.float32)
    # fn = nn.Linear(dim, dim), PyTorch-style uniform init (stored as (D_in, D_out)).
    bound = 1.0 / (D ** 0.5)
    w = jax.random.uniform(kw, (D, D), minval=-bound, maxval=bound,
                           dtype=jnp.float32)
    w_bias = jax.random.uniform(kb, (D,), minval=-bound, maxval=bound,
                                dtype=jnp.float32)
    return x, gamma, beta, w, w_bias


if __name__ == "__main__":
    # 1) f32 end-to-end, weight fully resident (no N-tiling).
    B, S, D = 2, 8, 128
    x, gamma, beta, w, w_bias = _make_inputs(jax.random.PRNGKey(0), B, S, D)
    out = prenorm_linear(x, gamma, beta, w, w_bias)
    jax.block_until_ready(out)
    ref = _reference(x, gamma, beta, w, w_bias)
    assert out.shape == (B, S, D)
    assert jnp.allclose(out, ref, atol=1e-4, rtol=1e-4), "mismatch (resident path)"

    # 2) Forced N-tiled path (scratch-resident LayerNorm, weight streams).
    x2, g2, b2, w2, wb2 = _make_inputs(jax.random.PRNGKey(1), 2, 8, 256)
    out2 = prenorm_linear(x2, g2, b2, w2, wb2, block_n=128)
    jax.block_until_ready(out2)
    ref2 = _reference(x2, g2, b2, w2, wb2)
    assert jnp.allclose(out2, ref2, atol=1e-4, rtol=1e-4), "mismatch (N-tiled path)"

    # 3) bf16 MXU feed with f32 accumulate (looser tolerance by construction).
    out3 = prenorm_linear(x, gamma, beta, w, w_bias, mxu_dtype=jnp.bfloat16)
    jax.block_until_ready(out3)
    assert jnp.allclose(out3, ref, atol=5e-2, rtol=5e-2), "mismatch (bf16 MXU path)"

    print("KERNEL_OK")
</pallas_src>

<mosaic_0001>
module attributes {stable_mosaic.version = 11 : i64} {
  func.func @_prenorm_linear_kernel(%arg0: i32, %arg1: memref<8x128xf32, #tpu.memory_space<vmem>>, %arg2: memref<128x128xf32, #tpu.memory_space<vmem>>, %arg3: memref<1x128xf32, #tpu.memory_space<vmem>>, %arg4: memref<8x128xf32, #tpu.memory_space<vmem>>) attributes {dimension_semantics = [#tpu.dimension_semantics<parallel>], iteration_bounds = array<i64: 2>, scalar_prefetch = 0 : i64, scratch_operands = 0 : i64, tpu.core_type = #tpu.core_type<tc>, window_params = [{transform_indices = @transform_0, window_bounds = array<i64: 8, 128>}, {pipeline_mode = #tpu.pipeline_mode<synchronous>, transform_indices = @transform_1, window_bounds = array<i64: 128, 128>}, {pipeline_mode = #tpu.pipeline_mode<synchronous>, transform_indices = @transform_2, window_bounds = array<i64: 1, 128>}, {transform_indices = @transform_3, window_bounds = array<i64: 8, 128>}]} {
    %c0 = arith.constant 0 : index
    %c0_0 = arith.constant 0 : index
    %0 = vector.load %arg1[%c0, %c0_0] : memref<8x128xf32, #tpu.memory_space<vmem>>, vector<8x128xf32>
    %cst = arith.constant dense<0.000000e+00> : vector<8xf32>
    %1 = vector.multi_reduction <add>, %0, %cst [1] : vector<8x128xf32> to vector<8xf32>
    %2 = vector.shape_cast %1 : vector<8xf32> to vector<8x1xf32>
    %cst_1 = arith.constant 1.280000e+02 : f32
    %3 = vector.broadcast %cst_1 : f32 to vector<8x1xf32>
    %4 = arith.divf %2, %3 : vector<8x1xf32>
    %5 = vector.broadcast %4 : vector<8x1xf32> to vector<8x128xf32>
    %6 = arith.subf %0, %5 : vector<8x128xf32>
    %7 = arith.mulf %6, %6 : vector<8x128xf32>
    %cst_2 = arith.constant dense<0.000000e+00> : vector<8xf32>
    %8 = vector.multi_reduction <add>, %7, %cst_2 [1] : vector<8x128xf32> to vector<8xf32>
    %9 = vector.shape_cast %8 : vector<8xf32> to vector<8x1xf32>
    %cst_3 = arith.constant 1.280000e+02 : f32
    %10 = vector.broadcast %cst_3 : f32 to vector<8x1xf32>
    %11 = arith.divf %9, %10 : vector<8x1xf32>
    %cst_4 = arith.constant 9.99999974E-6 : f32
    %12 = vector.broadcast %cst_4 : f32 to vector<8x1xf32>
    %13 = arith.addf %11, %12 : vector<8x1xf32>
    %14 = math.rsqrt %13 : vector<8x1xf32>
    %15 = vector.broadcast %14 : vector<8x1xf32> to vector<8x128xf32>
    %16 = arith.mulf %6, %15 : vector<8x128xf32>
    %c0_5 = arith.constant 0 : index
    %c0_6 = arith.constant 0 : index
    %17 = vector.load %arg2[%c0_5, %c0_6] : memref<128x128xf32, #tpu.memory_space<vmem>>, vector<128x128xf32>
    %cst_7 = arith.constant dense<0.000000e+00> : vector<8x128xf32>
    %18 = tpu.matmul %16, %17, %cst_7 {dimension_numbers = #tpu.dot_dimension_numbers<[1], [0], [0], [1], [0, 0, 1, 1], [], []>} : vector<8x128xf32>, vector<128x128xf32>, vector<8x128xf32> -> vector<8x128xf32>
    %c0_8 = arith.constant 0 : index
    %c0_9 = arith.constant 0 : index
    %19 = vector.load %arg3[%c0_8, %c0_9] : memref<1x128xf32, #tpu.memory_space<vmem>>, vector<1x128xf32>
    %20 = vector.broadcast %19 : vector<1x128xf32> to vector<8x128xf32>
    %21 = arith.addf %18, %20 : vector<8x128xf32>
    %c0_10 = arith.constant 0 : index
    %c0_11 = arith.constant 0 : index
    %22 = vector.load %arg4[%c0_10, %c0_11] : memref<8x128xf32, #tpu.memory_space<vmem>>, vector<8x128xf32>
    tpu.vector_store %arg4[%c0_10, %c0_11], %21 {strides = array<i32>} : memref<8x128xf32, #tpu.memory_space<vmem>>, vector<8x128xf32>,
    return
  }
  func.func @transform_0(%arg0: i32) -> (i32, i32) {
    %c0_i32 = arith.constant 0 : i32
    %c0_i32_0 = arith.constant 0 : i32
    return %arg0, %c0_i32 : i32, i32
  }
  func.func @transform_1(%arg0: i32) -> (i32, i32) {
    %c0_i32 = arith.constant 0 : i32
    %c0_i32_0 = arith.constant 0 : i32
    %c0_i32_1 = arith.constant 0 : i32
    return %c0_i32, %c0_i32_0 : i32, i32
  }
  func.func @transform_2(%arg0: i32) -> (i32, i32) {
    %c0_i32 = arith.constant 0 : i32
    %c0_i32_0 = arith.constant 0 : i32
    %c0_i32_1 = arith.constant 0 : i32
    return %c0_i32, %c0_i32_0 : i32, i32
  }
  func.func @transform_3(%arg0: i32) -> (i32, i32) {
    %c0_i32 = arith.constant 0 : i32
    %c0_i32_0 = arith.constant 0 : i32
    return %arg0, %c0_i32 : i32, i32
  }
}

</mosaic_0001>

<bundles_post_ra>
// kernel: tpu_custom_call.1
= control target key start
LH: loop header
LB: loop body
LE: loop exit
PB: predicated region body
PF: predicated region fallthrough
CT: control target
= control target key end

     0   :  { %8 = vsyncpa [#allocation3], 0  ;;  %s918_s0 = inlined_call_operand.hbm [shape: f32[16,128], index: 0, kind: input, shape index: {}]   ;;  %s919_s1 = inlined_call_operand.hbm [shape: f32[128,128], index: 1, kind: input, shape index: {}]   ;;  %s920_s2 = inlined_call_operand.vmem [shape: f32[1,128], index: 2, kind: input, shape index: {}]   ;;  %s921_s3 = inlined_call_operand.hbm [shape: f32[16,128], index: 3, kind: output, shape index: {}]  }
   0x1   :  { %10 = vsyncpa [#allocation3 + $0x1], 0 }
   0x2   :  { %11 = vsyncpa [#allocation6], 0 }
   0x3   :  { %12 = vsyncpa [#allocation4], 0 }
   0x4   :  { %14 = vsyncpa [#allocation4 + $0x1], 0  ;;  %s715_s12 = smov 0   ;;  %s717_s13 = smov 0  }
   0x5   :  { %s719_s14 = smov 0   ;;  %s721_s15 = smov 0  }
   0x6 LB: > { %s736_s16 = sadd.s32 4294967295, %s685_s15   ;;  %s402_s17 = sadd.s32 4294967294, %s685_s15   ;;  %s685_s15 = sphi %s721_s15, %s941_s15   ;;  %s681_s14 = sphi %s719_s14, %s940_s14   ;;  %s677_s13 = sphi %s717_s13, %s939_s13   ;;  %s673_s12 = sphi %s715_s12, %s938_s12  }
   0x7   : > { %p40_p0 = scmp.ne.s32.totalorder %s677_s13, %s673_s12  ;;  %p922_p1 = scmp.eq.s32.totalorder %s736_s16, 0 }
   0x8   : > { %p112_p3 = scmp.eq.s32.totalorder %s402_s17, 1  ;;  %p403_p5 = scmp.ge.s32.totalorder %s685_s15, 1 }
   0x9   : > { %p745_p4 = por %p922_p1, %p40_p0  ;;  %p119_p7 = scmp.lt.s32.totalorder %s685_s15, 3 }
   0xa   : > { %p750_p6 = por %p112_p3, %p40_p0  ;;  %s687_s21 = smov [#allocation5]  }
   0xb   : > { %s925_s18 = scalar_select %p745_p4, 1, 0 }
   0xc   : > { %s926_s19 = scalar_select %p750_p6, 1, 0 }
   0xd   : > { %p755_p8 = pnand %p403_p5, %p119_p7  ;;  %s131_s22 = sshll.u32 %s687_s21, 4  ;;  %s759_s22 = int_to_ptr.vmem [resolvable:$true] %s131_s22 }
   0xe   : > { %s771_s24 = sadd.s32 1, %s685_s15   ;;  %s27_s25 = sadd.s32 1, %s681_s14 }
   0xf   : > { %s927_s20 = scalar_select %p755_p8, 1, 0 }
  0x10   : > { %p501_p9 = pneg %p755_p8  ;;  %s24_s26 = ssub.s32 %s685_s15, %s771_s24 }
  0x11   : > { %s557_s29 = scalar_lea.hbm %s919_s1, 2048 }
  0x12   : > { %p766_p11 = pnand %p501_p9, %p922_p1  ;;  %p558_p12 = scmp.ne.s32.totalorder %s919_s1, %s557_s29 }
  0x13   : > { %p564_p5 = scmp.lt.u32.totalorder %s557_s29, %s919_s1 }
  0x14   : > { %p559_p13 = pneg %p766_p11 }
  0x16   : > { %p560_p0 = pnand %p559_p13, %p558_p12 }
  0x18   : > { %p561_p3 = pneg %p560_p0 }
  0x1a   : > { %p566_p7 = pnand %p564_p5, %p561_p3 }
  0x1c   : > { %569 = shalt.err (!%p566_p7)
}
  0x1d   : > { %s570_s7 = scalar_lea.vmem %s759_s22, 2048  ;;  %p578_p2 = scmp.lt.s32.totalorder %s759_s22, %s759_s22 }
  0x1e   : > { %p571_p9 = scmp.ne.s32.totalorder %s759_s22, %s570_s7  ;;  %p579_p6 = scmp.lt.s32.totalorder %s570_s7, %s570_s7 }
  0x20   : > { %p573_p10 = pnand %p571_p9, %p559_p13  ;;  %p580_p4 = por %p579_p6, %p578_p2 }
  0x22   : > { %p574_p1 = pneg %p573_p10 }
  0x24   : > { %p581_p8 = pnand %p580_p4, %p574_p1 }
  0x26   : > { %584 = shalt.err (!%p581_p8)
}
  0x27   : > { %s688_s8 = smov 128   ;;  %s689_s9 = smov 8  }
  0x28   : > { %504 = dma.hbm_to_vmem [thread:$0]  (!%p766_p11), %s919_s1, 2048, %s759_s22, [#allocation6], %s688_s8, %s688_s8, %s689_s9  }
  0x29   : > { %p25_p2 = scmp.eq.s32.totalorder %s24_s26, 0  ;;  %p34_p1 = scmp.ne.s32.totalorder %s681_s14, %s677_s13 }
  0x2a   : > { %p35_p4 = scmp.eq.s32.totalorder %s685_s15, 0  ;;  %p514_p6 = scmp.lt.s32.totalorder %s685_s15, 2 }
  0x2b   : > { %s802_s17 = scalar_select %p25_p2, %s681_s14, %s27_s25  }
  0x2c   : > { %p36_p8 = por %p35_p4, %p34_p1  ;;  %p929_p10 = scmp.eq.s32.totalorder %s736_s16, 1 }
  0x2d   : > { %s148_s27 = sand.u32 1, %s681_s14   ;;  %s407_s28 = sshll.u32 %s685_s15, 7 }
  0x2e   : > { %p806_p12 = por %p929_p10, %p34_p1  ;;  %s406_s29 = sshll.u32 %s148_s27, 3 }
  0x2f   : > { %s815_s4 = scalar_lea.hbm %s918_s0, %s407_s28  ;;  %s152_s22 = scalar_lea.vmem [#allocation2], %s406_s29 }
  0x30   : > { %s159_s25 = sshll.u32 %s152_s22, 4  ;;  %p817_p11 = pnand %p514_p6, %p36_p8  ;;  %s821_s25 = int_to_ptr.vmem [resolvable:$true] %s159_s25 }
  0x31   : > { %s149_s5 = scalar_lea.sflag [#allocation3], %s148_s27  ;;  %s585_s6 = scalar_lea.hbm %s815_s4, 128 }
  0x32   : > { %p586_p13 = scmp.ne.s32.totalorder %s815_s4, %s585_s6  ;;  %p587_p0 = pneg %p817_p11 }
  0x33   : > { %s590_s9 = scalar_lea.hbm %s918_s0, 256  ;;  %p591_p7 = scmp.lt.u32.totalorder %s815_s4, %s918_s0 }
  0x34   : > { %p588_p3 = pnand %p587_p0, %p586_p13  ;;  %p592_p9 = scmp.lt.u32.totalorder %s590_s9, %s585_s6 }
  0x35   : > { %p594_p1 = scmp.lt.u32.totalorder %s585_s6, %s815_s4 }
  0x36   : > { %p589_p5 = pneg %p588_p3  ;;  %p593_p2 = por %p592_p9, %p591_p7 }
  0x38   : > { %p595_p4 = por %p594_p1, %p593_p2 }
  0x3a   : > { %p596_p6 = pnand %p595_p4, %p589_p5 }
  0x3c   : > { %599 = shalt.err (!%p596_p6)
}
  0x3d   : > { %s600_s27 = scalar_lea.vmem %s821_s25, 128  ;;  %s690_s28 = smov [#allocation2]  }
  0x3e   : > { %p601_p8 = scmp.ne.s32.totalorder %s821_s25, %s600_s27  ;;  %s605_s29 = sshll.u32 %s690_s28, 4  ;;  %s606_s29 = int_to_ptr.vmem [resolvable:$false] %s605_s29 }
  0x3f   : > { %s607_s23 = scalar_lea.vmem %s606_s29, 256  ;;  %p608_p3 = scmp.lt.s32.totalorder %s821_s25, %s606_s29 }
  0x40   : > { %p603_p10 = pnand %p601_p8, %p587_p0  ;;  %p609_p7 = scmp.lt.s32.totalorder %s607_s23, %s600_s27 }
  0x42   : > { %p604_p13 = pneg %p603_p10  ;;  %p610_p9 = por %p609_p7, %p608_p3 }
  0x44   : > { %p611_p2 = pnand %p610_p9, %p604_p13 }
  0x46   : > { %614 = shalt.err (!%p611_p2)
}
  0x47   : > { %508 = dma.hbm_to_vmem [thread:$0]  (!%p817_p11), %s815_s4, 128, %s821_s25, %s149_s5  }
  0x48   : > { %p932_p5 = scmp.ne.s32.totalorder %s927_s20, 0 }
  0x49   : > { %s851_s30 = sand.u32 (!%p932_p5), 1, %s677_s13   ;;  %p933_p0 = scmp.ne.s32.totalorder (!%p932_p5), %s925_s18, 0 }
  0x4a   : > { %168 = sbr.rel (%p932_p5) target bundleno = 621 (0x26d), region = 32  ;;  %s409_s22 = sshll.u32 (!%p932_p5), %s851_s30, 3 }
  0x4b   : > { %s171_s6 = scalar_lea.sflag (!%p932_p5), [#allocation3], %s851_s30  ;;  %s174_s7 = scalar_lea.vmem (!%p932_p5), [#allocation2], %s409_s22 }
  0x51   : > { %660 = dma.done.wait (%p933_p0), %s171_s6, 128  }
  0x52   : > { %662 = vsyncadd (%p933_p0), %s171_s6, 4294967168  ;;  %p934_p11 = scmp.eq.s32.totalorder %s736_s16, 0 }
  0x54   : > { %664 = dma.done.wait (%p934_p11), [#allocation6], 2048   ;;  %p935_p1 = pmov %p934_p11 }
  0x55   : > { %v201_v0 = vld [vmem:[%s174_s7] sm:$0xff]  ;;  %v214_v1 = vld [vmem:[#allocation5] sm:$0xff]  ;;  %v215_v2 = vld [vmem:[#allocation5 + $0x8] sm:$0xff]  ;;  %v691_v4 = vmov 0.0|0.0   ;;  %vm692_vm0 = vmmov 0   ;;  %v693_v26 = vmov 0.0  }
  0x56   : > { %666 = vsyncadd (%p935_p1), [#allocation6], 4294965248  ;;  %202 = vadd.xlane.f32.xlu0 %v201_v0  ;;  %v216_v3 = vld [vmem:[#allocation5 + $0x10] sm:$0xff]  ;;  %469 = vmatprep.subr.bf16.mxu0 %v691_v4  ;;  %v470_v5 = vpack.c.bf16 %v215_v2, %v214_v1  ;;  %v217_v6 = vld [vmem:[#allocation5 + $0x18] sm:$0xff]  ;;  %s414_s4 = sshll.u32 %s736_s16, 7  ;;  %s200_s25 = scalar_lea.vmem [#allocation7], %s409_s22 }
  0x57   : > { %v473_v7 = vpack.c.bf16 %v217_v6, %v216_v3  ;;  %v218_v8 = vld [vmem:[#allocation5 + $0x20] sm:$0xff]  ;;  %v219_v9 = vld [vmem:[#allocation5 + $0x28] sm:$0xff]  ;;  %v220_v11 = vld [vmem:[#allocation5 + $0x30] sm:$0xff]  ;;  %466 = vmatprep.mubr.msk.f32.mxu0 %vm692_vm0, %v693_v26  ;;  %s322_s26 = sshll.u32 %s200_s25, 4  ;;  %s874_s9 = scalar_lea.hbm %s921_s3, %s414_s4  ;;  %s876_s26 = int_to_ptr.vmem [resolvable:$true] %s322_s26 }
  0x58   : > { %471 = vmatpush3.bf16.msra.mxu0 %v470_v5  ;;  %v476_v10 = vpack.c.bf16 %v219_v9, %v218_v8  ;;  %v221_v12 = vld [vmem:[#allocation5 + $0x38] sm:$0xff]  ;;  %v222_v18 = vld [vmem:[#allocation5 + $0x40] sm:$0xff]  ;;  %v223_v19 = vld [vmem:[#allocation5 + $0x48] sm:$0xff]  ;;  %s309_s10 = scalar_lea.sflag [#allocation4], %s851_s30  ;;  %s615_s11 = scalar_lea.vmem %s876_s26, 128 }
  0x59   : > { %472 = vmatprep.subr.bf16.mxu0 %v691_v4  ;;  %v479_v13 = vpack.c.bf16 %v221_v12, %v220_v11  ;;  %v482_v20 = vpack.c.bf16 %v223_v19, %v222_v18  ;;  %v224_v21 = vld [vmem:[#allocation5 + $0x50] sm:$0xff]  ;;  %v225_v22 = vld [vmem:[#allocation5 + $0x58] sm:$0xff]  ;;  %v226_v24 = vld [vmem:[#allocation5 + $0x60] sm:$0xff]  ;;  %p616_p4 = scmp.ne.s32.totalorder %s876_s26, %s615_s11  ;;  %s694_s16 = smov [#allocation7]  }
  0x5a   : > { %v485_v23 = vpack.c.bf16 %v225_v22, %v224_v21  ;;  %v227_v25 = vld [vmem:[#allocation5 + $0x68] sm:$0xff]  ;;  %v228_v28 = vld [vmem:[#allocation5 + $0x70] sm:$0xff]  ;;  %v229_v29 = vld [vmem:[#allocation5 + $0x78] sm:$0xff]  ;;  %s619_s27 = sshll.u32 %s694_s16, 4  ;;  %s620_s27 = int_to_ptr.vmem [resolvable:$false] %s619_s27 }
  0x5b   : > { %v488_v27 = vpack.c.bf16 %v227_v25, %v226_v24  ;;  %v491_v30 = vpack.c.bf16 %v229_v29, %v228_v28  ;;  %v412_v36 = vld [vmem:[%s920_s2] ss:$0 sm:$0xff]  ;;  %p617_p6 = pnand %p616_p4, %p806_p12  ;;  %s621_s28 = scalar_lea.vmem %s620_s27, 256 }
  0x5c   : > { %474 = vmatpush3.bf16.msra.mxu0 %v473_v7  ;;  %p622_p10 = scmp.lt.s32.totalorder %s876_s26, %s620_s27  ;;  %p623_p13 = scmp.lt.s32.totalorder %s621_s28, %s615_s11 }
  0x5d   : > { %475 = vmatprep.subr.bf16.mxu0 %v691_v4  ;;  %p618_p8 = pneg %p617_p6 }
  0x5e   : > { %p624_p3 = por %p623_p13, %p622_p10 }
  0x60   : > { %477 = vmatpush3.bf16.msra.mxu0 %v476_v10  ;;  %p625_p7 = pnand %p624_p3, %p618_p8 }
  0x61   : > { %478 = vmatprep.subr.bf16.mxu0 %v691_v4 }
  0x64   : > { %480 = vmatpush3.bf16.msra.mxu0 %v479_v13 }
  0x65   : > { %481 = vmatprep.subr.bf16.mxu0 %v691_v4 }
  0x68   : > { %483 = vmatpush3.bf16.msra.mxu0 %v482_v20 }
  0x69   : > { %484 = vmatprep.subr.bf16.mxu0 %v691_v4 }
  0x6c   : > { %486 = vmatpush3.bf16.msra.mxu0 %v485_v23 }
  0x6d   : > { %487 = vmatprep.subr.bf16.mxu0 %v691_v4 }
  0x70   : > { %489 = vmatpush3.bf16.msra.mxu0 %v488_v27 }
  0x71   : > { %490 = vmatprep.subr.bf16.mxu0 %v691_v4 }
  0x74   : > { %492 = vmatpush3.bf16.msra.mxu0 %v491_v30 }
  0xe3   : > { %v203_v14 = vpop.xlane.xlu0 %202 }
  0xe4   : > { %v205_v15 = vmul.f32 0.0078125, %v203_v14 }
  0xe6   : > { %v206_v16 = vsub.f32 %v201_v0, %v205_v15 }
  0xe8   : > { %v207_v17 = vmul.f32 %v206_v16, %v206_v16 }
  0xea   : > { %208 = vadd.xlane.f32.xlu0 %v207_v17 }
 0x177   : > { %v209_v31 = vpop.xlane.xlu0 %208 }
 0x178   : > { %v210_v32 = vmul.f32 0.0078125, %v209_v31 }
 0x17a   : > { %v211_v33 = vadd.f32 1e-05, %v210_v32 }
 0x17c   : > { %555 = vrsqrt.f32 %v211_v33 }
 0x186   : > { %v556_v34 = vpop.eup %555 }
 0x187   : > { %v213_v35 = vmul.f32 %v556_v34, %v206_v16 }
 0x189   : > { %467 = vmatmul.mubr.f32.vlgmr.msra.gmra.mrb[0].mxu0 %v213_v35 }
 0x25c   : > { %v303_v37 = vpop.f32.mrb[0].mxu0 }
 0x25d   : > { %v304_v38 = vadd.f32 %v412_v36, %v303_v37  ;;  %v468_v39 = vpop.f32.mrb[1].mxu0 }
 0x25f   : > { %307 = vst [vmem:[%s200_s25] sm:$0xff] %v304_v38 }
 0x260   : > { %628 = shalt.err (!%p625_p7)
}
 0x261   : > { %s629_s29 = scalar_lea.hbm %s874_s9, 128  ;;  %s633_s22 = scalar_lea.hbm %s921_s3, 256 }
 0x262   : > { %p630_p9 = scmp.ne.s32.totalorder %s874_s9, %s629_s29  ;;  %p634_p0 = scmp.lt.u32.totalorder %s874_s9, %s921_s3 }
 0x263   : > { %p635_p11 = scmp.lt.u32.totalorder %s633_s22, %s629_s29  ;;  %p637_p4 = scmp.lt.u32.totalorder %s629_s29, %s874_s9 }
 0x264   : > { %p631_p2 = pnand %p630_p9, %p806_p12 }
 0x265   : > { %p636_p1 = por %p635_p11, %p634_p0 }
 0x266   : > { %p632_p5 = pneg %p631_p2 }
 0x267   : > { %p638_p6 = por %p637_p4, %p636_p1 }
 0x269   : > { %p639_p8 = pnand %p638_p6, %p632_p5 }
 0x26b   : > { %642 = shalt.err (!%p639_p8)
}
 0x26c   : > { %499 = dma.vmem_to_hbm [thread:$0]  (%p806_p12), %s876_s26, 128, %s874_s9, %s309_s10  }
 0x26d PF: > { %s334_s18 = sand.u32 1, %s673_s12   ;;  %p936_p10 = scmp.ne.s32.totalorder %s926_s19, 0 }
 0x26e   : > { %p937_p13 = scmp.ge.s32.totalorder %s685_s15, 2  ;;  %s335_s20 = scalar_lea.sflag [#allocation4], %s334_s18 }
 0x270   : > { %p510_p3 = pnand %p937_p13, %p936_p10 }
 0x272   : > { %668 = dma.done.wait (!%p510_p3), %s335_s20, 128  }
 0x273   : > { %670 = vsyncadd (!%p510_p3), %s335_s20, 4294967168  ;;  %p17_p7 = scmp.ge.s32.totalorder %s771_s24, 4   ;;  %s938_s12 = smov %s677_s13 }
 0x274   : > { %s939_s13 = smov %s681_s14  ;;  %s940_s14 = smov %s802_s17 }
 0x275   : > { %s941_s15 = smov %s771_s24  ;;  %19 = sbr.rel (!%p17_p7) target bundleno = 6 (0x6), region = 81 }
 0x27c   :  { %340 = vsyncpa [#allocation3], 1 }
 0x27d   :  { %342 = vsyncpa [#allocation3 + $0x1], 1 }
 0x27e   :  { %343 = vsyncpa [#allocation6], 1 }
 0x27f   :  { %344 = vsyncpa [#allocation4], 1 }
 0x280   :  { %346 = vsyncpa [#allocation4 + $0x1], 1 }

</bundles_post_ra>
